<compile_context>
chip_gen: v7x
topology: tpu7x:2x2x1
jax: 0.10.0
libtpu: 0.0.40
codegen_flags: <defaults>
</compile_context>

<pallas_src>
import functools

import jax
import jax.numpy as jnp
from jax import lax
from jax.experimental import pallas as pl
from jax.experimental.pallas import tpu as pltpu

# Comfortably above v5e's 16 MiB scoped default, well below v7x's 64 MiB VMEM.
_VMEM_LIMIT = 32 * 1024 * 1024


def _round_up(x, m):
    return -(-x // m) * m


# ----------------------------------------------------------------------------
# Fused matmul:  relu((A @ W) + bias [+ residual])
#   A, W in bf16, f32 accumulation in a VMEM scratch, (M, N, K)-tiled grid.
# ----------------------------------------------------------------------------
def _mm_kernel(a_ref, b_ref, bias_ref, o_ref, acc_ref, *, relu):
    @pl.when(pl.program_id(2) == 0)
    def _():
        acc_ref[...] = jnp.zeros_like(acc_ref)

    acc_ref[...] += jnp.dot(a_ref[...], b_ref[...],
                            preferred_element_type=jnp.float32)

    @pl.when(pl.program_id(2) == pl.num_programs(2) - 1)
    def _():
        y = acc_ref[...] + bias_ref[...]
        if relu:
            y = jnp.maximum(y, 0.0)
        o_ref[...] = y.astype(o_ref.dtype)


def _mm_res_kernel(a_ref, b_ref, bias_ref, r_ref, o_ref, acc_ref, *, relu):
    @pl.when(pl.program_id(2) == 0)
    def _():
        acc_ref[...] = jnp.zeros_like(acc_ref)

    acc_ref[...] += jnp.dot(a_ref[...], b_ref[...],
                            preferred_element_type=jnp.float32)

    @pl.when(pl.program_id(2) == pl.num_programs(2) - 1)
    def _():
        y = acc_ref[...] + bias_ref[...] + r_ref[...].astype(jnp.float32)
        if relu:
            y = jnp.maximum(y, 0.0)
        o_ref[...] = y.astype(o_ref.dtype)


@functools.lru_cache(maxsize=None)
def _get_mm_fn(m_pad, k_pad, n_pad, tm, tk, tn, relu, has_res, out_dtype_name):
    a_spec = pl.BlockSpec((tm, tk), lambda i, j, kk: (i, kk))
    b_spec = pl.BlockSpec((tk, tn), lambda i, j, kk: (kk, j))
    v_spec = pl.BlockSpec((1, tn), lambda i, j, kk: (0, j))
    r_spec = pl.BlockSpec((tm, tn), lambda i, j, kk: (i, j))
    o_spec = pl.BlockSpec((tm, tn), lambda i, j, kk: (i, j))
    if has_res:
        kernel = functools.partial(_mm_res_kernel, relu=relu)
        in_specs = [a_spec, b_spec, v_spec, r_spec]
    else:
        kernel = functools.partial(_mm_kernel, relu=relu)
        in_specs = [a_spec, b_spec, v_spec]
    fn = pl.pallas_call(
        kernel,
        out_shape=jax.ShapeDtypeStruct((m_pad, n_pad),
                                       jnp.dtype(out_dtype_name)),
        grid=(m_pad // tm, n_pad // tn, k_pad // tk),
        in_specs=in_specs,
        out_specs=o_spec,
        scratch_shapes=[pltpu.VMEM((tm, tn), jnp.float32)],
        compiler_params=pltpu.CompilerParams(
            dimension_semantics=("parallel", "parallel", "arbitrary"),
            vmem_limit_bytes=_VMEM_LIMIT),
    )
    return jax.jit(fn)


def _choose_tiles(m, k, n):
    # M: fixed 256 tile (pad M up), or the full (8-rounded) extent if small.
    tm = 256 if m >= 256 else _round_up(m, 8)
    m_pad = _round_up(m, tm)
    # K: single full-K step when small, otherwise stream K in 256/384/512 tiles.
    if k <= 1024:
        k_pad, tk = k, k
    else:
        k_pad, tk = None, None
        for cand in (512, 384, 256):
            if k % cand == 0:
                k_pad, tk = k, cand
                break
        if tk is None:
            k_pad, tk = _round_up(k, 512), 512
    # N: pad to a multiple of 128 lanes; tile at <=512.
    n_pad = _round_up(n, 128)
    if n_pad <= 512:
        tn = n_pad
    elif n_pad % 512 == 0:
        tn = 512
    elif n_pad % 256 == 0:
        tn = 256
    else:
        tn = 128
    return m_pad, tm, k_pad, tk, n_pad, tn


def fused_matmul(a, b, bias, residual=None, relu=False,
                 out_dtype=jnp.bfloat16):
    """relu((a @ b) + bias [+ residual]) — a:[M,K], b:[K,N], bias:[N]."""
    m, k = a.shape
    n = b.shape[1]
    m_pad, tm, k_pad, tk, n_pad, tn = _choose_tiles(m, k, n)

    a = a.astype(jnp.bfloat16)
    b = b.astype(jnp.bfloat16)
    if m_pad != m or k_pad != k:
        a = jnp.pad(a, ((0, m_pad - m), (0, k_pad - k)))
    if k_pad != k or n_pad != n:
        b = jnp.pad(b, ((0, k_pad - k), (0, n_pad - n)))
    bias2 = bias.astype(jnp.float32).reshape(1, n)
    if n_pad != n:
        bias2 = jnp.pad(bias2, ((0, 0), (0, n_pad - n)))
    if residual is not None:
        residual = residual.astype(jnp.bfloat16)
        if m_pad != m or n_pad != n:
            residual = jnp.pad(residual, ((0, m_pad - m), (0, n_pad - n)))

    fn = _get_mm_fn(m_pad, k_pad, n_pad, tm, tk, tn, bool(relu),
                    residual is not None, jnp.dtype(out_dtype).name)
    if residual is None:
        out = fn(a, b, bias2)
    else:
        out = fn(a, b, bias2, residual)
    return out[:m, :n]


# ----------------------------------------------------------------------------
# MaxPool 3x3 stride 2 pad 1 — the nine shifted windows are produced by plain
# JAX strided slices (no stacked [9,M,C] tensor) and max-reduced in a Pallas
# kernel tiled over M.
# ----------------------------------------------------------------------------
def _max9_kernel(w0, w1, w2, w3, w4, w5, w6, w7, w8, o_ref):
    m01 = jnp.maximum(w0[...], w1[...])
    m23 = jnp.maximum(w2[...], w3[...])
    m45 = jnp.maximum(w4[...], w5[...])
    m67 = jnp.maximum(w6[...], w7[...])
    m = jnp.maximum(jnp.maximum(m01, m23), jnp.maximum(m45, m67))
    o_ref[...] = jnp.maximum(m, w8[...])


@functools.lru_cache(maxsize=None)
def _get_maxpool_fn(m_pad, tm, c):
    spec = pl.BlockSpec((tm, c), lambda i: (i, 0))
    fn = pl.pallas_call(
        _max9_kernel,
        out_shape=jax.ShapeDtypeStruct((m_pad, c), jnp.bfloat16),
        grid=(m_pad // tm,),
        in_specs=[spec] * 9,
        out_specs=spec,
        compiler_params=pltpu.CompilerParams(
            dimension_semantics=("parallel",),
            vmem_limit_bytes=_VMEM_LIMIT),
    )
    return jax.jit(fn)


def maxpool_3x3_s2_p1(x):
    nb, h, w, c = x.shape
    ho = (h + 2 - 3) // 2 + 1
    wo = (w + 2 - 3) // 2 + 1
    xp = jnp.pad(x, ((0, 0), (1, 1), (1, 1), (0, 0)),
                 constant_values=float("-inf"))
    windows = []
    for dy in range(3):
        for dx in range(3):
            win = lax.slice(xp, (0, dy, dx, 0),
                            (nb, dy + 2 * (ho - 1) + 1,
                             dx + 2 * (wo - 1) + 1, c),
                            (1, 2, 2, 1))
            windows.append(win.reshape(nb * ho * wo, c))
    m = nb * ho * wo
    tm = 512 if m >= 512 else _round_up(m, 8)
    m_pad = _round_up(m, tm)
    if m_pad != m:
        windows = [jnp.pad(wn, ((0, m_pad - m), (0, 0))) for wn in windows]
    fn = _get_maxpool_fn(m_pad, tm, c)
    out = fn(*windows)
    return out[:m].reshape(nb, ho, wo, c)


# ----------------------------------------------------------------------------
# Global avg-pool + fc (+ optional tanh) head kernel (f32 math, lane-padded).
# ----------------------------------------------------------------------------
def _head_kernel(x_ref, w_ref, b_ref, o_ref, *, tanh):
    feat = jnp.mean(x_ref[...].astype(jnp.float32), axis=1)     # [N, C]
    y = jnp.dot(feat, w_ref[...], preferred_element_type=jnp.float32)
    y = y + b_ref[...]
    if tanh:
        y = jnp.tanh(y)
    o_ref[...] = y


@functools.lru_cache(maxsize=None)
def _get_head_fn(nb, hw, c, d_pad, tanh):
    fn = pl.pallas_call(
        functools.partial(_head_kernel, tanh=tanh),
        out_shape=jax.ShapeDtypeStruct((nb, d_pad), jnp.float32),
        grid=(1,),
        in_specs=[pl.BlockSpec((nb, hw, c), lambda i: (0, 0, 0)),
                  pl.BlockSpec((c, d_pad), lambda i: (0, 0)),
                  pl.BlockSpec((1, d_pad), lambda i: (0, 0))],
        out_specs=pl.BlockSpec((nb, d_pad), lambda i: (0, 0)),
        compiler_params=pltpu.CompilerParams(
            dimension_semantics=("arbitrary",),
            vmem_limit_bytes=_VMEM_LIMIT),
    )
    return jax.jit(fn)


def avgpool_fc(x, w, b, tanh):
    nb, h, wd, c = x.shape
    x3 = x.reshape(nb, h * wd, c)
    dout = w.shape[1]
    d_pad = _round_up(dout, 128)
    w_p = jnp.pad(w.astype(jnp.float32), ((0, 0), (0, d_pad - dout)))
    b_p = jnp.pad(b.astype(jnp.float32).reshape(1, dout),
                  ((0, 0), (0, d_pad - dout)))
    fn = _get_head_fn(nb, h * wd, c, d_pad, bool(tanh))
    out = fn(x3, w_p, b_p)
    return out[:, :dout]


# ----------------------------------------------------------------------------
# im2col conv + folded BN wrapper
# ----------------------------------------------------------------------------
# TODO(synk): stride-1 3x3 convs still materialize im2col patches in HBM
# (bf16 so ~half the previous bytes); a rows+halo / manual-DMA fused conv
# would remove that traffic entirely.
def im2col(x, kh, kw, stride, pad):
    nb, h, w, c = x.shape
    xp = jnp.pad(x, ((0, 0), (pad, pad), (pad, pad), (0, 0)))
    hp, wp = h + 2 * pad, w + 2 * pad
    ho = (hp - kh) // stride + 1
    wo = (wp - kw) // stride + 1
    cols = []
    for i in range(kh):
        for j in range(kw):
            cols.append(lax.slice(
                xp, (0, i, j, 0),
                (nb, i + stride * (ho - 1) + 1, j + stride * (wo - 1) + 1, c),
                (1, stride, stride, 1)))
    patches = jnp.concatenate(cols, axis=-1)       # feature order (kh, kw, cin)
    return patches, ho, wo


def conv_bn(x, p, stride, pad, relu, residual=None):
    nb = x.shape[0]
    patches, ho, wo = im2col(x, p["k"], p["k"], stride, pad)
    m = nb * ho * wo
    a = patches.reshape(m, -1)
    res = residual.reshape(m, -1) if residual is not None else None
    cout = p["w"].shape[1]
    out = fused_matmul(a, p["w"], p["bias"], residual=res, relu=relu,
                       out_dtype=jnp.bfloat16)
    return out.reshape(nb, ho, wo, cout)


# ----------------------------------------------------------------------------
# Deterministic parameter construction (synthetic weights, ResNet-50 shapes).
# BN (inference mode) is folded: scale into the bf16 weight, bias kept f32.
# ----------------------------------------------------------------------------
class KeyGen:
    def __init__(self, key):
        self.key = key

    def __call__(self):
        self.key, sub = jax.random.split(self.key)
        return sub


def make_conv_bn_params(kg, cin, cout, k):
    w = jax.random.normal(kg(), (cout, cin, k, k), jnp.float32)
    w = w * (2.0 / (cin * k * k)) ** 0.5
    w2d = jnp.transpose(w, (2, 3, 1, 0)).reshape(k * k * cin, cout)
    gamma = 1.0 + 0.05 * jax.random.normal(kg(), (cout,), jnp.float32)
    beta = 0.05 * jax.random.normal(kg(), (cout,), jnp.float32)
    mean = 0.05 * jax.random.normal(kg(), (cout,), jnp.float32)
    var = jax.random.uniform(kg(), (cout,), jnp.float32, 0.5, 1.5)
    scale = gamma * lax.rsqrt(var + 1e-5)           # inference-mode BN folding
    bias = beta - mean * scale
    w2d = (w2d * scale[None, :]).astype(jnp.bfloat16)  # fold scale into weight
    return {"w": w2d, "bias": bias, "k": k}


def make_fc_series_params(kg, d_in, dims):
    layers = []
    for d_out in dims:
        bound = 1.0 / (d_in ** 0.5)
        w = jax.random.uniform(kg(), (d_in, d_out), jnp.float32, -bound, bound)
        b = jax.random.uniform(kg(), (d_out,), jnp.float32, -bound, bound)
        layers.append((w, b))
        d_in = d_out
    return layers


def make_params(key, hps):
    kg = KeyGen(key)
    params = {"conv1": make_conv_bn_params(kg, 3, 64, 7)}
    layers = []
    in_c = 64
    for width, nblocks, stride in [(64, 3, 1), (128, 4, 2),
                                   (256, 6, 2), (512, 3, 2)]:
        blocks = []
        for b in range(nblocks):
            s = stride if b == 0 else 1
            blk = {
                "conv1": make_conv_bn_params(kg, in_c, width, 1),
                "conv2": make_conv_bn_params(kg, width, width, 3),
                "conv3": make_conv_bn_params(kg, width, width * 4, 1),
                "stride": s,
            }
            if b == 0:
                blk["down"] = make_conv_bn_params(kg, in_c, width * 4, 1)
            blocks.append(blk)
            in_c = width * 4
        layers.append(blocks)
    params["layers"] = layers
    # model.fc re-init per ResnetModel.init_weights: weight U(-0.1,0.1), bias 0
    d_model = hps["d_model"]
    params["fc"] = (jax.random.uniform(kg(), (2048, d_model), jnp.float32,
                                       -0.1, 0.1),
                    jnp.zeros((d_model,), jnp.float32))
    buffer_dim = hps["buffer_dim"] if hps["do_buffer"] else []
    params["buffer"] = make_fc_series_params(kg, d_model, buffer_dim)
    return params


# ----------------------------------------------------------------------------
# Forward pass (ResNet-50 backbone -> fc -> [tanh] -> buffer FC series)
# ----------------------------------------------------------------------------
def bottleneck(x, p):
    s = p["stride"]
    out = conv_bn(x, p["conv1"], stride=1, pad=0, relu=True)
    out = conv_bn(out, p["conv2"], stride=s, pad=1, relu=True)
    if "down" in p:
        identity = conv_bn(x, p["down"], stride=s, pad=0, relu=False)
    else:
        identity = x
    # conv3 + BN + residual add + ReLU fused in one kernel
    out = conv_bn(out, p["conv3"], stride=1, pad=0, relu=True,
                  residual=identity)
    return out


def resnet_model_forward(params, x_nchw, hps):
    x = jnp.transpose(x_nchw, (0, 2, 3, 1)).astype(jnp.bfloat16)  # NCHW->NHWC
    x = conv_bn(x, params["conv1"], stride=2, pad=3, relu=True)
    x = maxpool_3x3_s2_p1(x)
    for blocks in params["layers"]:
        for blk in blocks:
            x = bottleneck(x, blk)

    fc_w, fc_b = params["fc"]
    use_tanh = (not hps["do_greedy"]) and (hps["do_quantise"]
                                           or hps["do_balance"])
    embed = avgpool_fc(x, fc_w, fc_b, tanh=use_tanh)
    # TODO(synk): hps.do_greedy path (GreedyHashLoss binariser) not implemented
    # — its definition is not part of this module; do_greedy=False path used.

    out = {"embedding": embed}
    h = embed
    nlayers = len(params["buffer"])
    for idx, (w, b) in enumerate(params["buffer"]):
        relu = (idx < nlayers - 1) or hps["buffer_relu_last"]
        h = fused_matmul(h, w, b, relu=relu, out_dtype=jnp.float32)
    out["regress"] = h
    return out


if __name__ == "__main__":
    hps = dict(d_model=32, do_greedy=False, do_quantise=True, do_balance=False,
               do_buffer=True, buffer_dim=[16, 8], buffer_relu_last=False)
    key = jax.random.PRNGKey(0)
    k_params, k_x = jax.random.split(key)
    params = make_params(k_params, hps)
    # Small image consistent with the 3-channel NCHW input of the module.
    x = jax.random.normal(k_x, (2, 3, 32, 32), jnp.float32)

    out = resnet_model_forward(params, x, hps)
    out = jax.block_until_ready(out)

    assert out["embedding"].shape == (2, hps["d_model"])
    assert out["regress"].shape == (2, hps["buffer_dim"][-1])
    assert bool(jnp.all(jnp.isfinite(out["embedding"])))
    assert bool(jnp.all(jnp.isfinite(out["regress"])))
    print("KERNEL_OK")
</pallas_src>

<mosaic_0001>
module attributes {stable_mosaic.version = 11 : i64} {
  func.func @_mm_kernel(%arg0: i32, %arg1: i32, %arg2: i32, %arg3: memref<256x147xbf16, #tpu.memory_space<vmem>>, %arg4: memref<147x128xbf16, #tpu.memory_space<vmem>>, %arg5: memref<1x128xf32, #tpu.memory_space<vmem>>, %arg6: memref<256x128xbf16, #tpu.memory_space<vmem>>, %arg7: memref<256x128xf32, #tpu.memory_space<vmem>>) attributes {dimension_semantics = [#tpu.dimension_semantics<parallel>, #tpu.dimension_semantics<parallel>, #tpu.dimension_semantics<arbitrary>], iteration_bounds = array<i64: 2, 1, 1>, scalar_prefetch = 0 : i64, scratch_operands = 1 : i64, tpu.core_type = #tpu.core_type<tc>, window_params = [{transform_indices = @transform_0, window_bounds = array<i64: 256, 147>}, {transform_indices = @transform_1, window_bounds = array<i64: 147, 128>}, {transform_indices = @transform_2, window_bounds = array<i64: 1, 128>}, {transform_indices = @transform_3, window_bounds = array<i64: 256, 128>}]} {
    %c0_i32 = arith.constant 0 : i32
    %0 = arith.cmpi eq, %arg2, %c0_i32 : i32
    %1 = arith.extui %0 : i1 to i32
    %c0_i32_0 = arith.constant 0 : i32
    %2 = arith.cmpi ne, %1, %c0_i32_0 : i32
    scf.if %2 {
      %cst_10 = arith.constant 0.000000e+00 : f32
      %12 = vector.broadcast %cst_10 : f32 to vector<256x128xf32>
      %c0_11 = arith.constant 0 : index
      %c0_12 = arith.constant 0 : index
      %13 = vector.load %arg7[%c0_11, %c0_12] : memref<256x128xf32, #tpu.memory_space<vmem>>, vector<256x128xf32>
      tpu.vector_store %arg7[%c0_11, %c0_12], %12 {strides = array<i32>} : memref<256x128xf32, #tpu.memory_space<vmem>>, vector<256x128xf32>,
    } else {
    }
    %c0 = arith.constant 0 : index
    %c0_1 = arith.constant 0 : index
    %3 = vector.load %arg7[%c0, %c0_1] : memref<256x128xf32, #tpu.memory_space<vmem>>, vector<256x128xf32>
    %c0_2 = arith.constant 0 : index
    %c0_3 = arith.constant 0 : index
    %4 = vector.load %arg3[%c0_2, %c0_3] : memref<256x147xbf16, #tpu.memory_space<vmem>>, vector<256x147xbf16>
    %c0_4 = arith.constant 0 : index
    %c0_5 = arith.constant 0 : index
    %5 = vector.load %arg4[%c0_4, %c0_5] : memref<147x128xbf16, #tpu.memory_space<vmem>>, vector<147x128xbf16>
    %cst = arith.constant dense<0.000000e+00> : vector<256x128xf32>
    %6 = tpu.matmul %4, %5, %cst {dimension_numbers = #tpu.dot_dimension_numbers<[1], [0], [0], [1], [0, 0, 1, 1], [], []>} : vector<256x147xbf16>, vector<147x128xbf16>, vector<256x128xf32> -> vector<256x128xf32>
    %7 = arith.addf %3, %6 : vector<256x128xf32>
    %c0_6 = arith.constant 0 : index
    %c0_7 = arith.constant 0 : index
    %8 = vector.load %arg7[%c0_6, %c0_7] : memref<256x128xf32, #tpu.memory_space<vmem>>, vector<256x128xf32>
    tpu.vector_store %arg7[%c0_6, %c0_7], %7 {strides = array<i32>} : memref<256x128xf32, #tpu.memory_space<vmem>>, vector<256x128xf32>,
    %c0_i32_8 = arith.constant 0 : i32
    %9 = arith.cmpi eq, %arg2, %c0_i32_8 : i32
    %10 = arith.extui %9 : i1 to i32
    %c0_i32_9 = arith.constant 0 : i32
    %11 = arith.cmpi ne, %10, %c0_i32_9 : i32
    scf.if %11 {
      %c0_10 = arith.constant 0 : index
      %c0_11 = arith.constant 0 : index
      %12 = vector.load %arg7[%c0_10, %c0_11] : memref<256x128xf32, #tpu.memory_space<vmem>>, vector<256x128xf32>
      %c0_12 = arith.constant 0 : index
      %c0_13 = arith.constant 0 : index
      %13 = vector.load %arg5[%c0_12, %c0_13] : memref<1x128xf32, #tpu.memory_space<vmem>>, vector<1x128xf32>
      %14 = vector.broadcast %13 : vector<1x128xf32> to vector<256x128xf32>
      %15 = arith.addf %12, %14 : vector<256x128xf32>
      %cst_14 = arith.constant 0.000000e+00 : f32
      %16 = vector.broadcast %cst_14 : f32 to vector<256x128xf32>
      %17 = arith.maximumf %15, %16 : vector<256x128xf32>
      %18 = arith.truncf %17 : vector<256x128xf32> to vector<256x128xbf16>
      %c0_15 = arith.constant 0 : index
      %c0_16 = arith.constant 0 : index
      %19 = vector.load %arg6[%c0_15, %c0_16] : memref<256x128xbf16, #tpu.memory_space<vmem>>, vector<256x128xbf16>
      tpu.vector_store %arg6[%c0_15, %c0_16], %18 {strides = array<i32>} : memref<256x128xbf16, #tpu.memory_space<vmem>>, vector<256x128xbf16>,
    } else {
    }
    return
  }
  func.func @transform_0(%arg0: i32, %arg1: i32, %arg2: i32) -> (i32, i32) {
    %c0_i32 = arith.constant 0 : i32
    return %arg0, %arg2 : i32, i32
  }
  func.func @transform_1(%arg0: i32, %arg1: i32, %arg2: i32) -> (i32, i32) {
    %c0_i32 = arith.constant 0 : i32
    return %arg2, %arg1 : i32, i32
  }
  func.func @transform_2(%arg0: i32, %arg1: i32, %arg2: i32) -> (i32, i32) {
    %c0_i32 = arith.constant 0 : i32
    %c0_i32_0 = arith.constant 0 : i32
    return %c0_i32, %arg1 : i32, i32
  }
  func.func @transform_3(%arg0: i32, %arg1: i32, %arg2: i32) -> (i32, i32) {
    %c0_i32 = arith.constant 0 : i32
    return %arg0, %arg1 : i32, i32
  }
}

</mosaic_0001>

<bundles_post_ra>
// kernel: tpu_custom_call.1
= control target key start
LH: loop header
LB: loop body
LE: loop exit
PB: predicated region body
PF: predicated region fallthrough
CT: control target
= control target key end

     0   :  { %8 = vsyncpa [#allocation4], 0  ;;  %s1985_s0 = inlined_call_operand.vmem [shape: bf16[512,147], index: 0, kind: input, shape index: {}]   ;;  %s1986_s1 = inlined_call_operand.vmem [shape: bf16[147,128], index: 1, kind: input, shape index: {}]   ;;  %s1987_s2 = inlined_call_operand.vmem [shape: f32[1,128], index: 2, kind: input, shape index: {}]   ;;  %s1988_s3 = inlined_call_operand.hbm [shape: bf16[512,128], index: 3, kind: output, shape index: {}]  }
   0x1   :  { %10 = vsyncpa [#allocation4 + $0x1], 0  ;;  %s1731_s12 = smov 0   ;;  %s1733_s13 = smov 0  }
   0x2   :  { %s1735_s14 = smov 0   ;;  %s1737_s15 = smov 0  }
   0x3   :  { %s1739_s16 = smov 0   ;;  %s1741_s17 = smov 0  }
   0x4 LB: > { %s1253_s18 = sadd.s32 4294967295, %s1704_s17   ;;  %s1254_s19 = sadd.s32 4294967294, %s1704_s17   ;;  %s1704_s17 = sphi %s1741_s17, %s16_s17   ;;  %s1700_s16 = sphi %s1739_s16, %s1995_s16   ;;  %s1696_s15 = sphi %s1737_s15, %s1994_s15   ;;  %s1692_s14 = sphi %s1735_s14, %s1993_s14   ;;  %s1688_s13 = sphi %s1733_s13, %s1992_s13   ;;  %s1684_s12 = sphi %s1731_s12, %s1991_s12  }
   0x5   : > { %s35_s20 = sadd.s32 1, %s1700_s16  ;;  %s126_s21 = sadd.s32 1, %s1692_s14 }
   0x6   : > { %p37_p0 = scmp.ge.s32.totalorder %s35_s20, 2  ;;  %p136_p1 = scmp.ne.s32.totalorder %s1692_s14, %s1688_s13 }
   0x7   : > { %p137_p2 = scmp.eq.s32.totalorder %s1253_s18, 1  ;;  %p142_p3 = scmp.ne.s32.totalorder %s1688_s13, %s1684_s12 }
   0x8   : > { %s1997_s20 = smov (%p37_p0, %s35_s20), 0  ;;  %p143_p5 = scmp.eq.s32.totalorder %s1254_s19, 1 }
   0x9   : > { %p1771_p4 = por %p137_p2, %p136_p1  ;;  %s121_s23 = ssub.s32 %s1700_s16, %s1997_s20 }
   0xa   : > { %p1259_p6 = scmp.ge.s32.totalorder %s1704_s17, 1  ;;  %p124_p7 = scmp.eq.s32.totalorder %s121_s23, 0 }
   0xb   : > { %p1778_p8 = por %p143_p5, %p142_p3  ;;  %p194_p9 = scmp.lt.s32.totalorder %s1704_s17, 3 }
   0xc   : > { %s1784_s25 = scalar_select %p124_p7, %s1692_s14, %s126_s21  }
   0xd   : > { %p195_p10 = pnand %p1259_p6, %p194_p9 }
   0xe   : > { %v1568_v0 = vld [vmem:[%s1986_s1] sm:$0xff] (!%p195_p10)   ;;  %v1706_v1 = vmov (!%p195_p10), 0   ;;  %v1569_v2 = vld [vmem:[%s1986_s1 + $0x8] sm:$0xff] (!%p195_p10)   ;;  %v1570_v3 = vld [vmem:[%s1986_s1 + $0x10] sm:$0xff] (!%p195_p10)   ;;  %s1261_s5 = sshll.u32 (!%p195_p10), %s1696_s15, 5  ;;  %vm580_vm0 = vcmask (!%p195_p10), 154624  }
   0xf   : > { %198 = sbr.rel (%p195_p10) target bundleno = 346 (0x15a), region = 32  ;;  %636 = vmatprep.subr.bf16.mxu0 (!%p195_p10), %v1706_v1  ;;  %1489 = vmatprep.subr.bf16.mxu1 (!%p195_p10), %v1706_v1  ;;  %p236_p11 = scmp.lt.s32.totalorder (!%p195_p10), %s1261_s5, 63  ;;  %v1571_v4 = vld [vmem:[%s1986_s1 + $0x18] sm:$0xff] (!%p195_p10)   ;;  %v1572_v5 = vld [vmem:[%s1986_s1 + $0x20] sm:$0xff] (!%p195_p10)   ;;  %v1573_v8 = vld [vmem:[%s1986_s1 + $0x28] sm:$0xff] (!%p195_p10)   ;;  %vm629_vm1 = vcmask (!%p195_p10), 1040384  }
  0x10   : > { %637 = vmatpush1.bf16.msra.mxu0 (!%p195_p10), %v1568_v0  ;;  %1499 = vmatpush1.bf16.msra.mxu1 (!%p195_p10), %v1568_v0  ;;  %v1574_v9 = vld [vmem:[%s1986_s1 + $0x30] sm:$0xff] (!%p195_p10)   ;;  %v1575_v10 = vld [vmem:[%s1986_s1 + $0x38] sm:$0xff] (!%p195_p10)   ;;  %vm630_vm2 = vcmask (!%p195_p10), 1041408   ;;  %v1707_v11 = vmov (!%p195_p10), 65535   ;;  %v1576_v13 = vld [vmem:[%s1986_s1 + $0x40] sm:$0xff] (!%p195_p10)   ;;  %s231_s9 = sand.u32 (!%p195_p10), 1, %s1688_s13  }
  0x11   : > { %638 = vmatprep.subr.bf16.mxu0 (!%p195_p10), %v1706_v1  ;;  %1490 = vmatprep.subr.bf16.mxu1 (!%p195_p10), %v1706_v1  ;;  %v631_v12 = vsel (!%p195_p10), %vm629_vm1, 4294967295, %v1707_v11  ;;  %v1577_v14 = vld [vmem:[%s1986_s1 + $0x48] ss:$0 sps:$4 sm:$0x33] (!%p195_p10)   ;;  %v1873_v47 = vld [vmem:[%s1987_s2] ss:$0 sm:$0xff] (!%p195_p10) }
  0x12   : > { %v632_v15 = vsel (!%p195_p10), %vm630_vm2, %v631_v12, 0  ;;  %s1260_s10 = sshll.u32 (!%p195_p10), %s231_s9, 7  ;;  %s1393_s18 = sshll.u32 (!%p195_p10), %s1696_s15, 11 }
  0x13   : > { %v634_v16 = vand.u32 (!%p195_p10), %v1577_v14, %v632_v15  ;;  %s1931_s26 = scalar_lea.hbm (!%p195_p10), %s1988_s3, %s1393_s18  ;;  %s1939_s15 = scalar_lea.sflag (!%p195_p10), [#allocation4], %s231_s9 }
  0x14   : > { %639 = vmatpush1.bf16.msra.mxu0 (!%p195_p10), %v1569_v2  ;;  %1500 = vmatpush1.bf16.msra.mxu1 (!%p195_p10), %v1569_v2  ;;  %s1708_s28 = smov (!%p195_p10), [#allocation3]  }
  0x15   : > { %640 = vmatprep.subr.bf16.mxu0 (!%p195_p10), %v1706_v1  ;;  %1491 = vmatprep.subr.bf16.mxu1 (!%p195_p10), %v1706_v1  ;;  %s1630_s29 = sshll.u32 (!%p195_p10), %s1708_s28, 4  ;;  %s1631_s29 = int_to_ptr.vmem [resolvable:$false] %s1630_s29 }
  0x16   : > { %s1999_s5 = smov (!%p236_p11, %s1261_s5), 63  ;;  %s1632_s30 = scalar_lea.vmem %s1631_s29, 4096 }
  0x17   : > { %s1360_s8 = sshll.u32 %s1999_s5, 3 }
  0x18   : > { %641 = vmatpush1.bf16.msra.mxu0 %v1570_v3  ;;  %1501 = vmatpush1.bf16.msra.mxu1 %v1570_v3  ;;  %s1802_s11 = scalar_lea.vmem %s1985_s0, %s1360_s8 }
  0x19   : > { %642 = vmatprep.subr.bf16.mxu0 %v1706_v1  ;;  %1492 = vmatprep.subr.bf16.mxu1 %v1706_v1  ;;  %v1580_v6 = vld [vmem:[%s1802_s11 + $0x4] ss:$8 sps:$4 sm:$0xff]   ;;  %v1578_v17 = vld [vmem:[%s1802_s11] ss:$8 sps:$4 sm:$0xff]   ;;  %v1584_v19 = vld [vmem:[%s1802_s11 + $0x14] ss:$8 sps:$4 sm:$0xff]  }
  0x1a   : > { %v1583_v7 = vld [vmem:[%s1802_s11 + $0x84] ss:$8 sps:$4 sm:$0xff]   ;;  %1306 = vmatprep.mubr.msk.bf16.mxu0 %vm580_vm0, %v1580_v6  ;;  %v1581_v18 = vld [vmem:[%s1802_s11 + $0x80] ss:$8 sps:$4 sm:$0xff]   ;;  %v1586_v20 = vld [vmem:[%s1802_s11 + $0x94] ss:$8 sps:$4 sm:$0xff]  }
  0x1b   : > { %1314 = vmatprep.mubr.msk.bf16.mxu1 %vm580_vm0, %v1583_v7  ;;  %v1588_v21 = vld [vmem:[%s1802_s11 + $0x10] ss:$8 sps:$4 sm:$0xff]   ;;  %v1590_v23 = vld [vmem:[%s1802_s11 + $0x24] ss:$8 sps:$4 sm:$0xff]   ;;  %v1594_v25 = vld [vmem:[%s1802_s11 + $0x20] ss:$8 sps:$4 sm:$0xff]  }
  0x1c   : > { %643 = vmatpush1.bf16.msra.mxu0 %v1571_v4  ;;  %1502 = vmatpush1.bf16.msra.mxu1 %v1571_v4  ;;  %v1589_v22 = vld [vmem:[%s1802_s11 + $0x90] ss:$8 sps:$4 sm:$0xff]   ;;  %v1592_v24 = vld [vmem:[%s1802_s11 + $0xa4] ss:$8 sps:$4 sm:$0xff]   ;;  %v1595_v26 = vld [vmem:[%s1802_s11 + $0xa0] ss:$8 sps:$4 sm:$0xff]  }
  0x1d   : > { %644 = vmatprep.subr.bf16.mxu0 %v1706_v1  ;;  %1493 = vmatprep.subr.bf16.mxu1 %v1706_v1  ;;  %v1596_v27 = vld [vmem:[%s1802_s11 + $0x34] ss:$8 sps:$4 sm:$0xff]   ;;  %v1600_v29 = vld [vmem:[%s1802_s11 + $0x30] ss:$8 sps:$4 sm:$0xff]   ;;  %v1602_v31 = vld [vmem:[%s1802_s11 + $0x44] ss:$8 sps:$4 sm:$0xff]  }
  0x1e   : > { %v1598_v28 = vld [vmem:[%s1802_s11 + $0xb4] ss:$8 sps:$4 sm:$0xff]   ;;  %v1601_v30 = vld [vmem:[%s1802_s11 + $0xb0] ss:$8 sps:$4 sm:$0xff]   ;;  %v1604_v32 = vld [vmem:[%s1802_s11 + $0xc4] ss:$8 sps:$4 sm:$0xff]  }
  0x1f   : > { %v1606_v33 = vld [vmem:[%s1802_s11 + $0x40] ss:$8 sps:$4 sm:$0xff]   ;;  %v1608_v35 = vld [vmem:[%s1802_s11 + $0x54] ss:$8 sps:$4 sm:$0xff]   ;;  %v1612_v37 = vld [vmem:[%s1802_s11 + $0x50] ss:$8 sps:$4 sm:$0xff]  }
  0x20   : > { %645 = vmatpush1.bf16.msra.mxu0 %v1572_v5  ;;  %1503 = vmatpush1.bf16.msra.mxu1 %v1572_v5  ;;  %v1607_v34 = vld [vmem:[%s1802_s11 + $0xc0] ss:$8 sps:$4 sm:$0xff]   ;;  %v1610_v36 = vld [vmem:[%s1802_s11 + $0xd4] ss:$8 sps:$4 sm:$0xff]   ;;  %v1613_v38 = vld [vmem:[%s1802_s11 + $0xd0] ss:$8 sps:$4 sm:$0xff]  }
  0x21   : > { %646 = vmatprep.subr.bf16.mxu0 %v1706_v1  ;;  %1494 = vmatprep.subr.bf16.mxu1 %v1706_v1  ;;  %v1614_v39 = vld [vmem:[%s1802_s11 + $0x64] ss:$8 sps:$4 sm:$0xff]   ;;  %v1618_v41 = vld [vmem:[%s1802_s11 + $0x60] ss:$8 sps:$4 sm:$0xff]   ;;  %v1620_v43 = vld [vmem:[%s1802_s11 + $0x74] ss:$8 sps:$4 sm:$0xff]  }
  0x22   : > { %v1616_v40 = vld [vmem:[%s1802_s11 + $0xe4] ss:$8 sps:$4 sm:$0xff]   ;;  %v1619_v42 = vld [vmem:[%s1802_s11 + $0xe0] ss:$8 sps:$4 sm:$0xff]   ;;  %v1622_v44 = vld [vmem:[%s1802_s11 + $0xf4] ss:$8 sps:$4 sm:$0xff]  }
  0x23   : > { %v1624_v45 = vld [vmem:[%s1802_s11 + $0x70] ss:$8 sps:$4 sm:$0xff]  }
  0x24   : > { %647 = vmatpush1.bf16.msra.mxu0 %v1573_v8  ;;  %1504 = vmatpush1.bf16.msra.mxu1 %v1573_v8  ;;  %v1625_v46 = vld [vmem:[%s1802_s11 + $0xf0] ss:$8 sps:$4 sm:$0xff]   ;;  %s1882_s11 = scalar_lea.vmem [#allocation3], %s1260_s10 }
  0x25   : > { %648 = vmatprep.subr.bf16.mxu0 %v1706_v1  ;;  %1495 = vmatprep.subr.bf16.mxu1 %v1706_v1  ;;  %s1142_s19 = sshll.u32 %s1882_s11, 4  ;;  %s1933_s19 = int_to_ptr.vmem [resolvable:$true] %s1142_s19 }
  0x26   : > { %s1626_s27 = scalar_lea.vmem %s1933_s19, 2048  ;;  %p1633_p1 = scmp.lt.s32.totalorder %s1933_s19, %s1631_s29 }
  0x27   : > { %p1627_p12 = scmp.ne.s32.totalorder %s1933_s19, %s1626_s27  ;;  %p1634_p2 = scmp.lt.s32.totalorder %s1632_s30, %s1626_s27 }
  0x28   : > { %649 = vmatpush1.bf16.msra.mxu0 %v1574_v9  ;;  %1505 = vmatpush1.bf16.msra.mxu1 %v1574_v9 }
  0x29   : > { %650 = vmatprep.subr.bf16.mxu0 %v1706_v1  ;;  %1496 = vmatprep.subr.bf16.mxu1 %v1706_v1  ;;  %p1628_p13 = pnand %p1627_p12, %p1771_p4  ;;  %p1635_p3 = por %p1634_p2, %p1633_p1 }
  0x2b   : > { %p1629_p0 = pneg %p1628_p13 }
  0x2c   : > { %651 = vmatpush1.bf16.msra.mxu0 %v1575_v10  ;;  %1506 = vmatpush1.bf16.msra.mxu1 %v1575_v10 }
  0x2d   : > { %652 = vmatprep.subr.bf16.mxu0 %v1706_v1  ;;  %1497 = vmatprep.subr.bf16.mxu1 %v1706_v1  ;;  %p1636_p5 = pnand %p1635_p3, %p1629_p0 }
  0x30   : > { %653 = vmatpush1.bf16.msra.mxu0 %v1576_v13  ;;  %1507 = vmatpush1.bf16.msra.mxu1 %v1576_v13 }
  0x31   : > { %654 = vmatprep.subr.bf16.mxu0 %v1706_v1  ;;  %1498 = vmatprep.subr.bf16.mxu1 %v1706_v1 }
  0x34   : > { %655 = vmatpush1.bf16.msra.mxu0 %v634_v16  ;;  %1508 = vmatpush1.bf16.msra.mxu1 %v634_v16 }
  0x37   : > { %669 = vmatmul.mubr.bf16.vlgmr.msra.gmra.mrb[0].mxu0 %v1578_v17  ;;  %733 = vmatmul.mubr.bf16.vlgmr.msra.gmra.mrb[0].mxu1 %v1581_v18 }
  0x38   : > { %1307 = vmatprep.mubr.msk.bf16.mxu0 %vm580_vm0, %v1584_v19  ;;  %1315 = vmatprep.mubr.msk.bf16.mxu1 %vm580_vm0, %v1586_v20 }
  0x3f   : > { %677 = vmatmul.mubr.bf16.gmra.mrb[4].mxu0 %v1588_v21  ;;  %741 = vmatmul.mubr.bf16.gmra.mrb[4].mxu1 %v1589_v22 }
  0x40   : > { %1308 = vmatprep.mubr.msk.bf16.mxu0 %vm580_vm0, %v1590_v23  ;;  %1316 = vmatprep.mubr.msk.bf16.mxu1 %vm580_vm0, %v1592_v24 }
  0x47   : > { %685 = vmatmul.mubr.bf16.gmra.mrb[8].mxu0 %v1594_v25  ;;  %749 = vmatmul.mubr.bf16.gmra.mrb[8].mxu1 %v1595_v26 }
  0x48   : > { %1309 = vmatprep.mubr.msk.bf16.mxu0 %vm580_vm0, %v1596_v27  ;;  %1317 = vmatprep.mubr.msk.bf16.mxu1 %vm580_vm0, %v1598_v28 }
  0x4f   : > { %693 = vmatmul.mubr.bf16.gmra.mrb[12].mxu0 %v1600_v29  ;;  %757 = vmatmul.mubr.bf16.gmra.mrb[12].mxu1 %v1601_v30 }
  0x50   : > { %1310 = vmatprep.mubr.msk.bf16.mxu0 %vm580_vm0, %v1602_v31  ;;  %1318 = vmatprep.mubr.msk.bf16.mxu1 %vm580_vm0, %v1604_v32 }
  0x57   : > { %701 = vmatmul.mubr.bf16.gmra.mrb[16].mxu0 %v1606_v33  ;;  %765 = vmatmul.mubr.bf16.gmra.mrb[16].mxu1 %v1607_v34 }
  0x58   : > { %1311 = vmatprep.mubr.msk.bf16.mxu0 %vm580_vm0, %v1608_v35  ;;  %1319 = vmatprep.mubr.msk.bf16.mxu1 %vm580_vm0, %v1610_v36 }
  0x5f   : > { %709 = vmatmul.mubr.bf16.gmra.mrb[20].mxu0 %v1612_v37  ;;  %773 = vmatmul.mubr.bf16.gmra.mrb[20].mxu1 %v1613_v38 }
  0x60   : > { %1312 = vmatprep.mubr.msk.bf16.mxu0 %vm580_vm0, %v1614_v39  ;;  %1320 = vmatprep.mubr.msk.bf16.mxu1 %vm580_vm0, %v1616_v40 }
  0x67   : > { %717 = vmatmul.mubr.bf16.gmra.mrb[24].mxu0 %v1618_v41  ;;  %781 = vmatmul.mubr.bf16.gmra.mrb[24].mxu1 %v1619_v42 }
  0x68   : > { %1313 = vmatprep.mubr.msk.bf16.mxu0 %vm580_vm0, %v1620_v43  ;;  %1321 = vmatprep.mubr.msk.bf16.mxu1 %vm580_vm0, %v1622_v44 }
  0x6f   : > { %725 = vmatmul.mubr.bf16.gmra.mrb[28].mxu0 %v1624_v45  ;;  %789 = vmatmul.mubr.bf16.gmra.mrb[28].mxu1 %v1625_v46 }
 0x10a   : > { %v670_v48 = vpop.f32.mrb[0].mxu0  ;;  %v734_v49 = vpop.f32.mrb[0].mxu1 }
 0x10b   : > { %v903_v50 = vadd.f32 %v1873_v47, %v670_v48  ;;  %v919_v51 = vadd.f32 %v1873_v47, %v734_v49  ;;  %v672_v52 = vpop.f32.mrb[1].mxu0  ;;  %v736_v53 = vpop.f32.mrb[1].mxu1 }
 0x10c   : > { %v673_v54 = vpop.f32.mrb[2].mxu0  ;;  %v737_v55 = vpop.f32.mrb[2].mxu1 }
 0x10d   : > { %v904_v56 = vadd.f32 %v1873_v47, %v673_v54  ;;  %v920_v57 = vadd.f32 %v1873_v47, %v737_v55  ;;  %v675_v58 = vpop.f32.mrb[3].mxu0  ;;  %v739_v59 = vpop.f32.mrb[3].mxu1  ;;  %v935_v60 = vmax.f32 %v903_v50, 0.0  ;;  %v951_v61 = vmax.f32 %v919_v51, 0.0 }
 0x10f   : > { %v936_v62 = vmax.f32 %v904_v56, 0.0  ;;  %v952_v63 = vmax.f32 %v920_v57, 0.0 }
 0x111   : > { %v1397_v0 = vpack.c.bf16 %v936_v62, %v935_v60  ;;  %v1437_v1 = vpack.c.bf16 %v952_v63, %v951_v61 }
 0x112   : > { %v678_v2 = vpop.f32.mrb[4].mxu0  ;;  %v742_v3 = vpop.f32.mrb[4].mxu1 }
 0x113   : > { %1398 = vst [vmem:[%s1882_s11] sm:$0xff] %v1397_v0   ;;  %1481 = vst [vmem:[%s1882_s11 + $0x40] sm:$0xff] %v1437_v1   ;;  %v905_v4 = vadd.f32 %v1873_v47, %v678_v2  ;;  %v921_v5 = vadd.f32 %v1873_v47, %v742_v3  ;;  %v680_v6 = vpop.f32.mrb[5].mxu0  ;;  %v744_v7 = vpop.f32.mrb[5].mxu1 }
 0x114   : > { %v681_v8 = vpop.f32.mrb[6].mxu0  ;;  %v745_v9 = vpop.f32.mrb[6].mxu1 }
 0x115   : > { %v906_v10 = vadd.f32 %v1873_v47, %v681_v8  ;;  %v922_v11 = vadd.f32 %v1873_v47, %v745_v9  ;;  %v683_v12 = vpop.f32.mrb[7].mxu0  ;;  %v747_v13 = vpop.f32.mrb[7].mxu1  ;;  %v937_v14 = vmax.f32 %v905_v4, 0.0  ;;  %v953_v15 = vmax.f32 %v921_v5, 0.0 }
 0x117   : > { %v938_v16 = vmax.f32 %v906_v10, 0.0  ;;  %v954_v17 = vmax.f32 %v922_v11, 0.0 }
 0x119   : > { %v1402_v18 = vpack.c.bf16 %v938_v16, %v937_v14  ;;  %v1442_v19 = vpack.c.bf16 %v954_v17, %v953_v15 }
 0x11a   : > { %v686_v20 = vpop.f32.mrb[8].mxu0  ;;  %v750_v21 = vpop.f32.mrb[8].mxu1 }
 0x11b   : > { %1474 = vst [vmem:[%s1882_s11 + $0x8] sm:$0xff] %v1402_v18   ;;  %1482 = vst [vmem:[%s1882_s11 + $0x48] sm:$0xff] %v1442_v19   ;;  %v907_v22 = vadd.f32 %v1873_v47, %v686_v20  ;;  %v923_v23 = vadd.f32 %v1873_v47, %v750_v21  ;;  %v688_v24 = vpop.f32.mrb[9].mxu0  ;;  %v752_v25 = vpop.f32.mrb[9].mxu1 }
 0x11c   : > { %v689_v26 = vpop.f32.mrb[10].mxu0  ;;  %v753_v27 = vpop.f32.mrb[10].mxu1 }
 0x11d   : > { %v908_v28 = vadd.f32 %v1873_v47, %v689_v26  ;;  %v924_v29 = vadd.f32 %v1873_v47, %v753_v27  ;;  %v691_v30 = vpop.f32.mrb[11].mxu0  ;;  %v755_v31 = vpop.f32.mrb[11].mxu1  ;;  %v939_v32 = vmax.f32 %v907_v22, 0.0  ;;  %v955_v33 = vmax.f32 %v923_v23, 0.0 }
 0x11f   : > { %v940_v34 = vmax.f32 %v908_v28, 0.0  ;;  %v956_v35 = vmax.f32 %v924_v29, 0.0 }
 0x121   : > { %v1407_v36 = vpack.c.bf16 %v940_v34, %v939_v32  ;;  %v1447_v37 = vpack.c.bf16 %v956_v35, %v955_v33 }
 0x122   : > { %v694_v38 = vpop.f32.mrb[12].mxu0  ;;  %v758_v39 = vpop.f32.mrb[12].mxu1 }
 0x123   : > { %1475 = vst [vmem:[%s1882_s11 + $0x10] sm:$0xff] %v1407_v36   ;;  %1483 = vst [vmem:[%s1882_s11 + $0x50] sm:$0xff] %v1447_v37   ;;  %v909_v40 = vadd.f32 %v1873_v47, %v694_v38  ;;  %v925_v41 = vadd.f32 %v1873_v47, %v758_v39  ;;  %v696_v42 = vpop.f32.mrb[13].mxu0  ;;  %v760_v43 = vpop.f32.mrb[13].mxu1 }
 0x124   : > { %v697_v44 = vpop.f32.mrb[14].mxu0  ;;  %v761_v45 = vpop.f32.mrb[14].mxu1 }
 0x125   : > { %v910_v46 = vadd.f32 %v1873_v47, %v697_v44  ;;  %v926_v48 = vadd.f32 %v1873_v47, %v761_v45  ;;  %v699_v49 = vpop.f32.mrb[15].mxu0  ;;  %v763_v50 = vpop.f32.mrb[15].mxu1  ;;  %v941_v51 = vmax.f32 %v909_v40, 0.0  ;;  %v957_v52 = vmax.f32 %v925_v41, 0.0 }
 0x127   : > { %v942_v53 = vmax.f32 %v910_v46, 0.0  ;;  %v958_v54 = vmax.f32 %v926_v48, 0.0 }
 0x129   : > { %v1412_v55 = vpack.c.bf16 %v942_v53, %v941_v51  ;;  %v1452_v56 = vpack.c.bf16 %v958_v54, %v957_v52 }
 0x12a   : > { %v702_v57 = vpop.f32.mrb[16].mxu0  ;;  %v766_v58 = vpop.f32.mrb[16].mxu1 }
 0x12b   : > { %1476 = vst [vmem:[%s1882_s11 + $0x18] sm:$0xff] %v1412_v55   ;;  %1484 = vst [vmem:[%s1882_s11 + $0x58] sm:$0xff] %v1452_v56   ;;  %v911_v59 = vadd.f32 %v1873_v47, %v702_v57  ;;  %v927_v60 = vadd.f32 %v1873_v47, %v766_v58  ;;  %v704_v61 = vpop.f32.mrb[17].mxu0  ;;  %v768_v62 = vpop.f32.mrb[17].mxu1 }
 0x12c   : > { %v705_v63 = vpop.f32.mrb[18].mxu0  ;;  %v769_v0 = vpop.f32.mrb[18].mxu1 }
 0x12d   : > { %v912_v1 = vadd.f32 %v1873_v47, %v705_v63  ;;  %v928_v2 = vadd.f32 %v1873_v47, %v769_v0  ;;  %v707_v3 = vpop.f32.mrb[19].mxu0  ;;  %v771_v4 = vpop.f32.mrb[19].mxu1  ;;  %v943_v5 = vmax.f32 %v911_v59, 0.0  ;;  %v959_v6 = vmax.f32 %v927_v60, 0.0 }
 0x12f   : > { %v944_v7 = vmax.f32 %v912_v1, 0.0  ;;  %v960_v8 = vmax.f32 %v928_v2, 0.0 }
 0x131   : > { %v1417_v9 = vpack.c.bf16 %v944_v7, %v943_v5  ;;  %v1457_v10 = vpack.c.bf16 %v960_v8, %v959_v6 }
 0x132   : > { %v710_v11 = vpop.f32.mrb[20].mxu0  ;;  %v774_v12 = vpop.f32.mrb[20].mxu1 }
 0x133   : > { %1477 = vst [vmem:[%s1882_s11 + $0x20] sm:$0xff] %v1417_v9   ;;  %1485 = vst [vmem:[%s1882_s11 + $0x60] sm:$0xff] %v1457_v10   ;;  %v913_v13 = vadd.f32 %v1873_v47, %v710_v11  ;;  %v929_v14 = vadd.f32 %v1873_v47, %v774_v12  ;;  %v712_v15 = vpop.f32.mrb[21].mxu0  ;;  %v776_v16 = vpop.f32.mrb[21].mxu1 }
 0x134   : > { %v713_v17 = vpop.f32.mrb[22].mxu0  ;;  %v777_v18 = vpop.f32.mrb[22].mxu1 }
 0x135   : > { %v914_v19 = vadd.f32 %v1873_v47, %v713_v17  ;;  %v930_v20 = vadd.f32 %v1873_v47, %v777_v18  ;;  %v715_v21 = vpop.f32.mrb[23].mxu0  ;;  %v779_v22 = vpop.f32.mrb[23].mxu1  ;;  %v945_v23 = vmax.f32 %v913_v13, 0.0  ;;  %v961_v24 = vmax.f32 %v929_v14, 0.0 }
 0x137   : > { %v946_v25 = vmax.f32 %v914_v19, 0.0  ;;  %v962_v26 = vmax.f32 %v930_v20, 0.0 }
 0x139   : > { %v1422_v27 = vpack.c.bf16 %v946_v25, %v945_v23  ;;  %v1462_v28 = vpack.c.bf16 %v962_v26, %v961_v24 }
 0x13a   : > { %v718_v29 = vpop.f32.mrb[24].mxu0  ;;  %v782_v30 = vpop.f32.mrb[24].mxu1 }
 0x13b   : > { %1478 = vst [vmem:[%s1882_s11 + $0x28] sm:$0xff] %v1422_v27   ;;  %1486 = vst [vmem:[%s1882_s11 + $0x68] sm:$0xff] %v1462_v28   ;;  %v915_v31 = vadd.f32 %v1873_v47, %v718_v29  ;;  %v931_v32 = vadd.f32 %v1873_v47, %v782_v30  ;;  %v720_v33 = vpop.f32.mrb[25].mxu0  ;;  %v784_v34 = vpop.f32.mrb[25].mxu1 }
 0x13c   : > { %v721_v35 = vpop.f32.mrb[26].mxu0  ;;  %v785_v36 = vpop.f32.mrb[26].mxu1 }
 0x13d   : > { %v916_v37 = vadd.f32 %v1873_v47, %v721_v35  ;;  %v932_v38 = vadd.f32 %v1873_v47, %v785_v36  ;;  %v723_v39 = vpop.f32.mrb[27].mxu0  ;;  %v787_v40 = vpop.f32.mrb[27].mxu1  ;;  %v947_v41 = vmax.f32 %v915_v31, 0.0  ;;  %v963_v42 = vmax.f32 %v931_v32, 0.0 }
 0x13f   : > { %v948_v43 = vmax.f32 %v916_v37, 0.0  ;;  %v964_v44 = vmax.f32 %v932_v38, 0.0 }
 0x141   : > { %v1427_v45 = vpack.c.bf16 %v948_v43, %v947_v41  ;;  %v1467_v46 = vpack.c.bf16 %v964_v44, %v963_v42 }
 0x142   : > { %v726_v48 = vpop.f32.mrb[28].mxu0  ;;  %v790_v49 = vpop.f32.mrb[28].mxu1 }
 0x143   : > { %1479 = vst [vmem:[%s1882_s11 + $0x30] sm:$0xff] %v1427_v45   ;;  %1487 = vst [vmem:[%s1882_s11 + $0x70] sm:$0xff] %v1467_v46   ;;  %v917_v50 = vadd.f32 %v1873_v47, %v726_v48  ;;  %v933_v51 = vadd.f32 %v1873_v47, %v790_v49  ;;  %v728_v52 = vpop.f32.mrb[29].mxu0  ;;  %v792_v53 = vpop.f32.mrb[29].mxu1 }
 0x144   : > { %v729_v54 = vpop.f32.mrb[30].mxu0  ;;  %v793_v55 = vpop.f32.mrb[30].mxu1 }
 0x145   : > { %v918_v56 = vadd.f32 %v1873_v47, %v729_v54  ;;  %v934_v57 = vadd.f32 %v1873_v47, %v793_v55  ;;  %v731_v58 = vpop.f32.mrb[31].mxu0  ;;  %v795_v59 = vpop.f32.mrb[31].mxu1  ;;  %v949_v60 = vmax.f32 %v917_v50, 0.0  ;;  %v965_v61 = vmax.f32 %v933_v51, 0.0 }
 0x147   : > { %v950_v62 = vmax.f32 %v918_v56, 0.0  ;;  %v966_v63 = vmax.f32 %v934_v57, 0.0 }
 0x149   : > { %v1432_v47 = vpack.c.bf16 %v950_v62, %v949_v60  ;;  %v1472_v0 = vpack.c.bf16 %v966_v63, %v965_v61 }
 0x14b   : > { %1480 = vst [vmem:[%s1882_s11 + $0x38] sm:$0xff] %v1432_v47   ;;  %1488 = vst [vmem:[%s1882_s11 + $0x78] sm:$0xff] %v1472_v0  }
 0x14c   : > { %1639 = shalt.err (!%p1636_p5)
}
 0x14d   : > { %s1640_s4 = scalar_lea.hbm %s1931_s26, 2048  ;;  %s1644_s7 = scalar_lea.hbm %s1988_s3, 4096 }
 0x14e   : > { %p1641_p6 = scmp.ne.s32.totalorder %s1931_s26, %s1640_s4  ;;  %p1645_p10 = scmp.lt.u32.totalorder %s1931_s26, %s1988_s3 }
 0x14f   : > { %p1646_p11 = scmp.lt.u32.totalorder %s1644_s7, %s1640_s4  ;;  %p1648_p13 = scmp.lt.u32.totalorder %s1640_s4, %s1931_s26 }
 0x150   : > { %p1642_p7 = pnand %p1641_p6, %p1771_p4 }
 0x151   : > { %p1647_p12 = por %p1646_p11, %p1645_p10 }
 0x152   : > { %p1643_p9 = pneg %p1642_p7 }
 0x153   : > { %p1649_p0 = por %p1648_p13, %p1647_p12 }
 0x155   : > { %p1650_p1 = pnand %p1649_p0, %p1643_p9 }
 0x157   : > { %1653 = shalt.err (!%p1650_p1)
}
 0x158   : > { %s1709_s10 = smov 64   ;;  %s1710_s11 = smov 4  }
 0x159   : > { %1509 = dma.vmem_to_hbm [thread:$0]  (%p1771_p4), %s1933_s19, 2048, %s1931_s26, %s1939_s15, %s1709_s10, %s1709_s10, %s1710_s11  }
 0x15a PF: > { %p1515_p2 = scmp.ge.s32.totalorder %s1704_s17, 2  ;;  %s1157_s18 = sand.u32 1, %s1684_s12  }
 0x15b   : > { %s1158_s21 = scalar_lea.sflag [#allocation4], %s1157_s18 }
 0x15c   : > { %p1512_p3 = pnand %p1515_p2, %p1778_p8 }
 0x15e   : > { %1679 = dma.done.wait (!%p1512_p3), %s1158_s21, 2048  }
 0x15f   : > { %1681 = vsyncadd (!%p1512_p3), %s1158_s21, 4294965248  ;;  %s16_s17 = sadd.s32 1, %s1704_s17   ;;  %s1991_s12 = smov %s1688_s13 }
 0x160   : > { %p13_p5 = scmp.ge.s32.totalorder %s16_s17, 4   ;;  %s1992_s13 = smov %s1692_s14 }
 0x161   : > { %s1993_s14 = smov %s1784_s25  ;;  %s1994_s15 = smov %s1700_s16 }
 0x162   : > { %s1995_s16 = smov %s1997_s20  ;;  %15 = sbr.rel (!%p13_p5) target bundleno = 4 (0x4), region = 81 }
 0x169   :  { %1163 = vsyncpa [#allocation4], 1 }
 0x16a   :  { %1165 = vsyncpa [#allocation4 + $0x1], 1 }

</bundles_post_ra>
